<compile_context>
chip_gen: v6e
topology: v6e:2x2x1
jax: 0.10.0
libtpu: 0.0.40
codegen_flags: <defaults>
</compile_context>

<pallas_src>
import jax
import jax.numpy as jnp
import numpy as np
from jax import lax
from jax.experimental import pallas as pl
from jax.experimental.pallas import tpu as pltpu

# Module configuration (EALSTM(input_size_dyn=5, input_size_stat=4, hidden=32))
INPUT_SIZE_DYN = 5
INPUT_SIZE_STAT = 4
HIDDEN_SIZE = 32


# ---------------------------------------------------------------------------
# Pallas kernel: whole EA-LSTM recurrence in one invocation
# ---------------------------------------------------------------------------
def _ealstm_kernel(xd_ref, xs_ref, wih_ref, whh_ref, wsh_ref, b_ref, bs_ref,
                   hn_ref, cn_ref, xw_scr):
    """EA-LSTM forward.

    xd_ref : (T*B, F_dyn)  time-major flattened dynamic inputs
    xs_ref : (B, F_stat)   static inputs
    wih_ref: (F_dyn, 3H)   weight_ih        whh_ref: (H, 3H) weight_hh
    wsh_ref: (F_stat, H)   weight_sh
    b_ref  : (1, 3H)       bias             bs_ref : (1, H)  bias_s
    hn_ref : (T, B, H) out                  cn_ref : (T, B, H) out
    xw_scr : (T*B, 3H) VMEM scratch holding the hoisted input projection.
    Gate chunk order along 3H is [f | o | g] (matches the PyTorch module).
    """
    T, B, H = hn_ref.shape

    # Hoisted input projection: one big MXU matmul instead of T tiny ones.
    xw_scr[...] = (
        jnp.dot(xd_ref[...], wih_ref[...], preferred_element_type=jnp.float32)
        + b_ref[...])

    # Static (entity-aware) input gate, computed once for the whole sequence.
    i_gate = jax.nn.sigmoid(
        jnp.dot(xs_ref[...], wsh_ref[...], preferred_element_type=jnp.float32)
        + bs_ref[...])

    def step(t, carry):
        h, c = carry
        row = t * B
        gates = xw_scr[pl.ds(row, B), :] + jnp.dot(
            h, whh_ref[...], preferred_element_type=jnp.float32)
        f = jax.nn.sigmoid(gates[:, 0 * H:1 * H])
        o = jax.nn.sigmoid(gates[:, 1 * H:2 * H])
        g = jnp.tanh(gates[:, 2 * H:3 * H])
        c_new = f * c + i_gate * g
        h_new = o * jnp.tanh(c_new)
        hn_ref[t] = h_new
        cn_ref[t] = c_new
        return h_new, c_new

    zeros = jnp.zeros((B, H), jnp.float32)
    lax.fori_loop(0, T, step, (zeros, zeros), unroll=(T <= 32))


# ---------------------------------------------------------------------------
# Wrapper: mirrors EALSTM.forward (batch_first=True)
# ---------------------------------------------------------------------------
@jax.jit
def ealstm_forward(x_d, x_s, params):
    """x_d: (B, T, F_dyn), x_s: (B, F_stat). Returns (h_n, c_n), each (B, T, H)."""
    x_d = x_d.astype(jnp.float32)
    x_s = x_s.astype(jnp.float32)
    B, T, F = x_d.shape
    H = params["weight_hh"].shape[0]

    # Time-major, flattened view so the in-kernel hoisted projection is one
    # matmul and the per-step slice is a contiguous (B, 3H) row block.
    x_tm = jnp.transpose(x_d, (1, 0, 2)).reshape(T * B, F)
    bias = params["bias"].reshape(1, 3 * H).astype(jnp.float32)
    bias_s = params["bias_s"].reshape(1, H).astype(jnp.float32)

    vmem = pl.BlockSpec(memory_space=pltpu.MemorySpace.VMEM)
    hn_tm, cn_tm = pl.pallas_call(
        _ealstm_kernel,
        out_shape=(jax.ShapeDtypeStruct((T, B, H), jnp.float32),
                   jax.ShapeDtypeStruct((T, B, H), jnp.float32)),
        in_specs=[vmem] * 7,
        out_specs=(vmem, vmem),
        scratch_shapes=[pltpu.VMEM((T * B, 3 * H), jnp.float32)],
    )(x_tm, x_s,
      params["weight_ih"].astype(jnp.float32),
      params["weight_hh"].astype(jnp.float32),
      params["weight_sh"].astype(jnp.float32),
      bias, bias_s)

    # batch-first outputs, as in the PyTorch module with batch_first=True
    h_n = jnp.transpose(hn_tm, (1, 0, 2))
    c_n = jnp.transpose(cn_tm, (1, 0, 2))
    return h_n, c_n


# ---------------------------------------------------------------------------
# Pure-JAX reference (exact EALSTM.forward semantics) for correctness check
# ---------------------------------------------------------------------------
def ealstm_reference(x_d, x_s, params):
    x_d = x_d.astype(jnp.float32)
    x_s = x_s.astype(jnp.float32)
    B, T, _ = x_d.shape
    H = params["weight_hh"].shape[0]

    i = jax.nn.sigmoid(x_s @ params["weight_sh"] + params["bias_s"])

    def step(carry, x_t):
        h, c = carry
        gates = h @ params["weight_hh"] + params["bias"] + x_t @ params["weight_ih"]
        f = jax.nn.sigmoid(gates[:, 0 * H:1 * H])
        o = jax.nn.sigmoid(gates[:, 1 * H:2 * H])
        g = jnp.tanh(gates[:, 2 * H:3 * H])
        c_new = f * c + i * g
        h_new = o * jnp.tanh(c_new)
        return (h_new, c_new), (h_new, c_new)

    init = (jnp.zeros((B, H), jnp.float32), jnp.zeros((B, H), jnp.float32))
    _, (hs, cs) = lax.scan(step, init, jnp.transpose(x_d, (1, 0, 2)))
    return jnp.transpose(hs, (1, 0, 2)), jnp.transpose(cs, (1, 0, 2))


# ---------------------------------------------------------------------------
# Parameter init mirroring EALSTM.reset_parameters
# ---------------------------------------------------------------------------
def _orthogonal(key, rows, cols):
    """Semi-orthogonal init (torch.nn.init.orthogonal_ analogue)."""
    big, small = max(rows, cols), min(rows, cols)
    a = jax.random.normal(key, (big, small), jnp.float32)
    q, _ = jnp.linalg.qr(a)
    return q if rows >= cols else q.T


def init_params(key, input_size_dyn, input_size_stat, hidden_size,
                initial_forget_bias=0):
    k_ih, k_sh = jax.random.split(key, 2)
    w_ih = _orthogonal(k_ih, input_size_dyn, 3 * hidden_size)
    w_sh = _orthogonal(k_sh, input_size_stat, hidden_size)
    w_hh = jnp.tile(jnp.eye(hidden_size, dtype=jnp.float32), (1, 3))
    bias = jnp.zeros((3 * hidden_size,), jnp.float32)
    if initial_forget_bias != 0:
        bias = bias.at[:hidden_size].set(float(initial_forget_bias))
    bias_s = jnp.zeros((hidden_size,), jnp.float32)
    return {
        "weight_ih": w_ih,      # (F_dyn, 3H)
        "weight_hh": w_hh,      # (H, 3H)
        "weight_sh": w_sh,      # (F_stat, H)
        "bias": bias,           # (3H,)
        "bias_s": bias_s,       # (H,)
    }


if __name__ == "__main__":
    B, T = 8, 8

    key = jax.random.PRNGKey(0)
    k_xd, k_xs, k_p = jax.random.split(key, 3)

    x_d = jax.random.normal(k_xd, (B, T, INPUT_SIZE_DYN), jnp.float32)
    x_s = jax.random.normal(k_xs, (B, INPUT_SIZE_STAT), jnp.float32)
    params = init_params(k_p, INPUT_SIZE_DYN, INPUT_SIZE_STAT, HIDDEN_SIZE)

    h_n, c_n = ealstm_forward(x_d, x_s, params)
    jax.block_until_ready((h_n, c_n))

    h_ref, c_ref = ealstm_reference(x_d, x_s, params)
    np.testing.assert_allclose(np.asarray(h_n), np.asarray(h_ref), rtol=1e-4, atol=1e-4)
    np.testing.assert_allclose(np.asarray(c_n), np.asarray(c_ref), rtol=1e-4, atol=1e-4)

    assert h_n.shape == (B, T, HIDDEN_SIZE) and c_n.shape == (B, T, HIDDEN_SIZE)
    print("KERNEL_OK")
</pallas_src>

<mosaic_0001>
module attributes {stable_mosaic.version = 11 : i64} {
  func.func @_ealstm_kernel(%arg0: memref<64x5xf32, #tpu.memory_space<vmem>>, %arg1: memref<8x4xf32, #tpu.memory_space<vmem>>, %arg2: memref<5x96xf32, #tpu.memory_space<vmem>>, %arg3: memref<32x96xf32, #tpu.memory_space<vmem>>, %arg4: memref<4x32xf32, #tpu.memory_space<vmem>>, %arg5: memref<1x96xf32, #tpu.memory_space<vmem>>, %arg6: memref<1x32xf32, #tpu.memory_space<vmem>>, %arg7: memref<8x8x32xf32, #tpu.memory_space<vmem>>, %arg8: memref<8x8x32xf32, #tpu.memory_space<vmem>>, %arg9: memref<64x96xf32, #tpu.memory_space<vmem>>) attributes {dimension_semantics = [], scalar_prefetch = 0 : i64, scratch_operands = 1 : i64, tpu.core_type = #tpu.core_type<tc>} {
    %c0 = arith.constant 0 : index
    %c0_0 = arith.constant 0 : index
    %0 = vector.load %arg0[%c0, %c0_0] : memref<64x5xf32, #tpu.memory_space<vmem>>, vector<64x5xf32>
    %c0_1 = arith.constant 0 : index
    %c0_2 = arith.constant 0 : index
    %1 = vector.load %arg2[%c0_1, %c0_2] : memref<5x96xf32, #tpu.memory_space<vmem>>, vector<5x96xf32>
    %cst = arith.constant dense<0.000000e+00> : vector<64x96xf32>
    %2 = tpu.matmul %0, %1, %cst {dimension_numbers = #tpu.dot_dimension_numbers<[1], [0], [0], [1], [0, 0, 1, 1], [], []>} : vector<64x5xf32>, vector<5x96xf32>, vector<64x96xf32> -> vector<64x96xf32>
    %c0_3 = arith.constant 0 : index
    %c0_4 = arith.constant 0 : index
    %3 = vector.load %arg5[%c0_3, %c0_4] : memref<1x96xf32, #tpu.memory_space<vmem>>, vector<1x96xf32>
    %4 = vector.broadcast %3 : vector<1x96xf32> to vector<64x96xf32>
    %5 = arith.addf %2, %4 : vector<64x96xf32>
    %c0_5 = arith.constant 0 : index
    %c0_6 = arith.constant 0 : index
    %6 = vector.load %arg9[%c0_5, %c0_6] : memref<64x96xf32, #tpu.memory_space<vmem>>, vector<64x96xf32>
    tpu.vector_store %arg9[%c0_5, %c0_6], %5 {strides = array<i32>} : memref<64x96xf32, #tpu.memory_space<vmem>>, vector<64x96xf32>,
    %c0_7 = arith.constant 0 : index
    %c0_8 = arith.constant 0 : index
    %7 = vector.load %arg1[%c0_7, %c0_8] : memref<8x4xf32, #tpu.memory_space<vmem>>, vector<8x4xf32>
    %c0_9 = arith.constant 0 : index
    %c0_10 = arith.constant 0 : index
    %8 = vector.load %arg4[%c0_9, %c0_10] : memref<4x32xf32, #tpu.memory_space<vmem>>, vector<4x32xf32>
    %cst_11 = arith.constant dense<0.000000e+00> : vector<8x32xf32>
    %9 = tpu.matmul %7, %8, %cst_11 {dimension_numbers = #tpu.dot_dimension_numbers<[1], [0], [0], [1], [0, 0, 1, 1], [], []>} : vector<8x4xf32>, vector<4x32xf32>, vector<8x32xf32> -> vector<8x32xf32>
    %c0_12 = arith.constant 0 : index
    %c0_13 = arith.constant 0 : index
    %10 = vector.load %arg6[%c0_12, %c0_13] : memref<1x32xf32, #tpu.memory_space<vmem>>, vector<1x32xf32>
    %11 = vector.broadcast %10 : vector<1x32xf32> to vector<8x32xf32>
    %12 = arith.addf %9, %11 : vector<8x32xf32>
    %13 = arith.negf %12 : vector<8x32xf32>
    %14 = math.exp %13 : vector<8x32xf32>
    %cst_14 = arith.constant 1.000000e+00 : f32
    %15 = vector.broadcast %cst_14 : f32 to vector<8x32xf32>
    %16 = arith.addf %15, %14 : vector<8x32xf32>
    %17 = arith.divf %15, %16 : vector<8x32xf32>
    %cst_15 = arith.constant 0.000000e+00 : f32
    %18 = vector.broadcast %cst_15 : f32 to vector<8x32xf32>
    %c0_i32 = arith.constant 0 : i32
    %c8_i32 = arith.constant 8 : i32
    %19 = arith.muli %c0_i32, %c8_i32 : i32
    %20 = arith.index_cast %19 : i32 to index
    %c0_16 = arith.constant 0 : index
    %21 = vector.load %arg9[%20, %c0_16] : memref<64x96xf32, #tpu.memory_space<vmem>>, vector<8x96xf32>
    %c0_17 = arith.constant 0 : index
    %c0_18 = arith.constant 0 : index
    %22 = vector.load %arg3[%c0_17, %c0_18] : memref<32x96xf32, #tpu.memory_space<vmem>>, vector<32x96xf32>
    %cst_19 = arith.constant dense<0.000000e+00> : vector<8x96xf32>
    %23 = tpu.matmul %18, %22, %cst_19 {dimension_numbers = #tpu.dot_dimension_numbers<[1], [0], [0], [1], [0, 0, 1, 1], [], []>} : vector<8x32xf32>, vector<32x96xf32>, vector<8x96xf32> -> vector<8x96xf32>
    %24 = arith.addf %21, %23 : vector<8x96xf32>
    %25 = vector.extract_strided_slice %24 {offsets = [0, 0], sizes = [8, 32], strides = [1, 1]} : vector<8x96xf32> to vector<8x32xf32>
    %26 = arith.negf %25 : vector<8x32xf32>
    %27 = math.exp %26 : vector<8x32xf32>
    %cst_20 = arith.constant 1.000000e+00 : f32
    %28 = vector.broadcast %cst_20 : f32 to vector<8x32xf32>
    %29 = arith.addf %28, %27 : vector<8x32xf32>
    %30 = arith.divf %28, %29 : vector<8x32xf32>
    %31 = vector.extract_strided_slice %24 {offsets = [0, 32], sizes = [8, 32], strides = [1, 1]} : vector<8x96xf32> to vector<8x32xf32>
    %32 = arith.negf %31 : vector<8x32xf32>
    %33 = math.exp %32 : vector<8x32xf32>
    %cst_21 = arith.constant 1.000000e+00 : f32
    %34 = vector.broadcast %cst_21 : f32 to vector<8x32xf32>
    %35 = arith.addf %34, %33 : vector<8x32xf32>
    %36 = arith.divf %34, %35 : vector<8x32xf32>
    %37 = vector.extract_strided_slice %24 {offsets = [0, 64], sizes = [8, 32], strides = [1, 1]} : vector<8x96xf32> to vector<8x32xf32>
    %38 = math.tanh %37 : vector<8x32xf32>
    %39 = arith.mulf %30, %18 : vector<8x32xf32>
    %40 = arith.mulf %17, %38 : vector<8x32xf32>
    %41 = arith.addf %39, %40 : vector<8x32xf32>
    %42 = math.tanh %41 : vector<8x32xf32>
    %43 = arith.mulf %36, %42 : vector<8x32xf32>
    %44 = arith.index_cast %c0_i32 : i32 to index
    %c0_22 = arith.constant 0 : index
    %c0_23 = arith.constant 0 : index
    %45 = vector.load %arg7[%44, %c0_22, %c0_23] : memref<8x8x32xf32, #tpu.memory_space<vmem>>, vector<1x8x32xf32>
    %46 = vector.shape_cast %45 : vector<1x8x32xf32> to vector<8x32xf32>
    %47 = vector.shape_cast %43 : vector<8x32xf32> to vector<1x8x32xf32>
    tpu.vector_store %arg7[%44, %c0_22, %c0_23], %47 {strides = array<i32>} : memref<8x8x32xf32, #tpu.memory_space<vmem>>, vector<1x8x32xf32>,
    %48 = arith.index_cast %c0_i32 : i32 to index
    %c0_24 = arith.constant 0 : index
    %c0_25 = arith.constant 0 : index
    %49 = vector.load %arg8[%48, %c0_24, %c0_25] : memref<8x8x32xf32, #tpu.memory_space<vmem>>, vector<1x8x32xf32>
    %50 = vector.shape_cast %49 : vector<1x8x32xf32> to vector<8x32xf32>
    %51 = vector.shape_cast %41 : vector<8x32xf32> to vector<1x8x32xf32>
    tpu.vector_store %arg8[%48, %c0_24, %c0_25], %51 {strides = array<i32>} : memref<8x8x32xf32, #tpu.memory_space<vmem>>, vector<1x8x32xf32>,
    %c1_i32 = arith.constant 1 : i32
    %c8_i32_26 = arith.constant 8 : i32
    %52 = arith.muli %c1_i32, %c8_i32_26 : i32
    %53 = arith.index_cast %52 : i32 to index
    %c0_27 = arith.constant 0 : index
    %54 = vector.load %arg9[%53, %c0_27] : memref<64x96xf32, #tpu.memory_space<vmem>>, vector<8x96xf32>
    %c0_28 = arith.constant 0 : index
    %c0_29 = arith.constant 0 : index
    %55 = vector.load %arg3[%c0_28, %c0_29] : memref<32x96xf32, #tpu.memory_space<vmem>>, vector<32x96xf32>
    %cst_30 = arith.constant dense<0.000000e+00> : vector<8x96xf32>
    %56 = tpu.matmul %43, %55, %cst_30 {dimension_numbers = #tpu.dot_dimension_numbers<[1], [0], [0], [1], [0, 0, 1, 1], [], []>} : vector<8x32xf32>, vector<32x96xf32>, vector<8x96xf32> -> vector<8x96xf32>
    %57 = arith.addf %54, %56 : vector<8x96xf32>
    %58 = vector.extract_strided_slice %57 {offsets = [0, 0], sizes = [8, 32], strides = [1, 1]} : vector<8x96xf32> to vector<8x32xf32>
    %59 = arith.negf %58 : vector<8x32xf32>
    %60 = math.exp %59 : vector<8x32xf32>
    %cst_31 = arith.constant 1.000000e+00 : f32
    %61 = vector.broadcast %cst_31 : f32 to vector<8x32xf32>
    %62 = arith.addf %61, %60 : vector<8x32xf32>
    %63 = arith.divf %61, %62 : vector<8x32xf32>
    %64 = vector.extract_strided_slice %57 {offsets = [0, 32], sizes = [8, 32], strides = [1, 1]} : vector<8x96xf32> to vector<8x32xf32>
    %65 = arith.negf %64 : vector<8x32xf32>
    %66 = math.exp %65 : vector<8x32xf32>
    %cst_32 = arith.constant 1.000000e+00 : f32
    %67 = vector.broadcast %cst_32 : f32 to vector<8x32xf32>
    %68 = arith.addf %67, %66 : vector<8x32xf32>
    %69 = arith.divf %67, %68 : vector<8x32xf32>
    %70 = vector.extract_strided_slice %57 {offsets = [0, 64], sizes = [8, 32], strides = [1, 1]} : vector<8x96xf32> to vector<8x32xf32>
    %71 = math.tanh %70 : vector<8x32xf32>
    %72 = arith.mulf %63, %41 : vector<8x32xf32>
    %73 = arith.mulf %17, %71 : vector<8x32xf32>
    %74 = arith.addf %72, %73 : vector<8x32xf32>
    %75 = math.tanh %74 : vector<8x32xf32>
    %76 = arith.mulf %69, %75 : vector<8x32xf32>
    %77 = arith.index_cast %c1_i32 : i32 to index
    %c0_33 = arith.constant 0 : index
    %c0_34 = arith.constant 0 : index
    %78 = vector.load %arg7[%77, %c0_33, %c0_34] : memref<8x8x32xf32, #tpu.memory_space<vmem>>, vector<1x8x32xf32>
    %79 = vector.shape_cast %78 : vector<1x8x32xf32> to vector<8x32xf32>
    %80 = vector.shape_cast %76 : vector<8x32xf32> to vector<1x8x32xf32>
    tpu.vector_store %arg7[%77, %c0_33, %c0_34], %80 {strides = array<i32>} : memref<8x8x32xf32, #tpu.memory_space<vmem>>, vector<1x8x32xf32>,
    %81 = arith.index_cast %c1_i32 : i32 to index
    %c0_35 = arith.constant 0 : index
    %c0_36 = arith.constant 0 : index
    %82 = vector.load %arg8[%81, %c0_35, %c0_36] : memref<8x8x32xf32, #tpu.memory_space<vmem>>, vector<1x8x32xf32>
    %83 = vector.shape_cast %82 : vector<1x8x32xf32> to vector<8x32xf32>
    %84 = vector.shape_cast %74 : vector<8x32xf32> to vector<1x8x32xf32>
    tpu.vector_store %arg8[%81, %c0_35, %c0_36], %84 {strides = array<i32>} : memref<8x8x32xf32, #tpu.memory_space<vmem>>, vector<1x8x32xf32>,
    %c2_i32 = arith.constant 2 : i32
    %c8_i32_37 = arith.constant 8 : i32
    %85 = arith.muli %c2_i32, %c8_i32_37 : i32
    %86 = arith.index_cast %85 : i32 to index
    %c0_38 = arith.constant 0 : index
    %87 = vector.load %arg9[%86, %c0_38] : memref<64x96xf32, #tpu.memory_space<vmem>>, vector<8x96xf32>
    %c0_39 = arith.constant 0 : index
    %c0_40 = arith.constant 0 : index
    %88 = vector.load %arg3[%c0_39, %c0_40] : memref<32x96xf32, #tpu.memory_space<vmem>>, vector<32x96xf32>
    %cst_41 = arith.constant dense<0.000000e+00> : vector<8x96xf32>
    %89 = tpu.matmul %76, %88, %cst_41 {dimension_numbers = #tpu.dot_dimension_numbers<[1], [0], [0], [1], [0, 0, 1, 1], [], []>} : vector<8x32xf32>, vector<32x96xf32>, vector<8x96xf32> -> vector<8x96xf32>
    %90 = arith.addf %87, %89 : vector<8x96xf32>
    %91 = vector.extract_strided_slice %90 {offsets = [0, 0], sizes = [8, 32], strides = [1, 1]} : vector<8x96xf32> to vector<8x32xf32>
    %92 = arith.negf %91 : vector<8x32xf32>
    %93 = math.exp %92 : vector<8x32xf32>
    %cst_42 = arith.constant 1.000000e+00 : f32
    %94 = vector.broadcast %cst_42 : f32 to vector<8x32xf32>
    %95 = arith.addf %94, %93 : vector<8x32xf32>
    %96 = arith.divf %94, %95 : vector<8x32xf32>
    %97 = vector.extract_strided_slice %90 {offsets = [0, 32], sizes = [8, 32], strides = [1, 1]} : vector<8x96xf32> to vector<8x32xf32>
    %98 = arith.negf %97 : vector<8x32xf32>
    %99 = math.exp %98 : vector<8x32xf32>
    %cst_43 = arith.constant 1.000000e+00 : f32
    %100 = vector.broadcast %cst_43 : f32 to vector<8x32xf32>
    %101 = arith.addf %100, %99 : vector<8x32xf32>
    %102 = arith.divf %100, %101 : vector<8x32xf32>
    %103 = vector.extract_strided_slice %90 {offsets = [0, 64], sizes = [8, 32], strides = [1, 1]} : vector<8x96xf32> to vector<8x32xf32>
    %104 = math.tanh %103 : vector<8x32xf32>
    %105 = arith.mulf %96, %74 : vector<8x32xf32>
    %106 = arith.mulf %17, %104 : vector<8x32xf32>
    %107 = arith.addf %105, %106 : vector<8x32xf32>
    %108 = math.tanh %107 : vector<8x32xf32>
    %109 = arith.mulf %102, %108 : vector<8x32xf32>
    %110 = arith.index_cast %c2_i32 : i32 to index
    %c0_44 = arith.constant 0 : index
    %c0_45 = arith.constant 0 : index
    %111 = vector.load %arg7[%110, %c0_44, %c0_45] : memref<8x8x32xf32, #tpu.memory_space<vmem>>, vector<1x8x32xf32>
    %112 = vector.shape_cast %111 : vector<1x8x32xf32> to vector<8x32xf32>
    %113 = vector.shape_cast %109 : vector<8x32xf32> to vector<1x8x32xf32>
    tpu.vector_store %arg7[%110, %c0_44, %c0_45], %113 {strides = array<i32>} : memref<8x8x32xf32, #tpu.memory_space<vmem>>, vector<1x8x32xf32>,
    %114 = arith.index_cast %c2_i32 : i32 to index
    %c0_46 = arith.constant 0 : index
    %c0_47 = arith.constant 0 : index
    %115 = vector.load %arg8[%114, %c0_46, %c0_47] : memref<8x8x32xf32, #tpu.memory_space<vmem>>, vector<1x8x32xf32>
    %116 = vector.shape_cast %115 : vector<1x8x32xf32> to vector<8x32xf32>
    %117 = vector.shape_cast %107 : vector<8x32xf32> to vector<1x8x32xf32>
    tpu.vector_store %arg8[%114, %c0_46, %c0_47], %117 {strides = array<i32>} : memref<8x8x32xf32, #tpu.memory_space<vmem>>, vector<1x8x32xf32>,
    %c3_i32 = arith.constant 3 : i32
    %c8_i32_48 = arith.constant 8 : i32
    %118 = arith.muli %c3_i32, %c8_i32_48 : i32
    %119 = arith.index_cast %118 : i32 to index
    %c0_49 = arith.constant 0 : index
    %120 = vector.load %arg9[%119, %c0_49] : memref<64x96xf32, #tpu.memory_space<vmem>>, vector<8x96xf32>
    %c0_50 = arith.constant 0 : index
    %c0_51 = arith.constant 0 : index
    %121 = vector.load %arg3[%c0_50, %c0_51] : memref<32x96xf32, #tpu.memory_space<vmem>>, vector<32x96xf32>
    %cst_52 = arith.constant dense<0.000000e+00> : vector<8x96xf32>
    %122 = tpu.matmul %109, %121, %cst_52 {dimension_numbers = #tpu.dot_dimension_numbers<[1], [0], [0], [1], [0, 0, 1, 1], [], []>} : vector<8x32xf32>, vector<32x96xf32>, vector<8x96xf32> -> vector<8x96xf32>
    %123 = arith.addf %120, %122 : vector<8x96xf32>
    %124 = vector.extract_strided_slice %123 {offsets = [0, 0], sizes = [8, 32], strides = [1, 1]} : vector<8x96xf32> to vector<8x32xf32>
    %125 = arith.negf %124 : vector<8x32xf32>
    %126 = math.exp %125 : vector<8x32xf32>
    %cst_53 = arith.constant 1.000000e+00 : f32
    %127 = vector.broadcast %cst_53 : f32 to vector<8x32xf32>
    %128 = arith.addf %127, %126 : vector<8x32xf32>
    %129 = arith.divf %127, %128 : vector<8x32xf32>
    %130 = vector.extract_strided_slice %123 {offsets = [0, 32], sizes = [8, 32], strides = [1, 1]} : vector<8x96xf32> to vector<8x32xf32>
    %131 = arith.negf %130 : vector<8x32xf32>
    %132 = math.exp %131 : vector<8x32xf32>
    %cst_54 = arith.constant 1.000000e+00 : f32
    %133 = vector.broadcast %cst_54 : f32 to vector<8x32xf32>
    %134 = arith.addf %133, %132 : vector<8x32xf32>
    %135 = arith.divf %133, %134 : vector<8x32xf32>
    %136 = vector.extract_strided_slice %123 {offsets = [0, 64], sizes = [8, 32], strides = [1, 1]} : vector<8x96xf32> to vector<8x32xf32>
    %137 = math.tanh %136 : vector<8x32xf32>
    %138 = arith.mulf %129, %107 : vector<8x32xf32>
    %139 = arith.mulf %17, %137 : vector<8x32xf32>
    %140 = arith.addf %138, %139 : vector<8x32xf32>
    %141 = math.tanh %140 : vector<8x32xf32>
    %142 = arith.mulf %135, %141 : vector<8x32xf32>
    %143 = arith.index_cast %c3_i32 : i32 to index
    %c0_55 = arith.constant 0 : index
    %c0_56 = arith.constant 0 : index
    %144 = vector.load %arg7[%143, %c0_55, %c0_56] : memref<8x8x32xf32, #tpu.memory_space<vmem>>, vector<1x8x32xf32>
    %145 = vector.shape_cast %144 : vector<1x8x32xf32> to vector<8x32xf32>
    %146 = vector.shape_cast %142 : vector<8x32xf32> to vector<1x8x32xf32>
    tpu.vector_store %arg7[%143, %c0_55, %c0_56], %146 {strides = array<i32>} : memref<8x8x32xf32, #tpu.memory_space<vmem>>, vector<1x8x32xf32>,
    %147 = arith.index_cast %c3_i32 : i32 to index
    %c0_57 = arith.constant 0 : index
    %c0_58 = arith.constant 0 : index
    %148 = vector.load %arg8[%147, %c0_57, %c0_58] : memref<8x8x32xf32, #tpu.memory_space<vmem>>, vector<1x8x32xf32>
    %149 = vector.shape_cast %148 : vector<1x8x32xf32> to vector<8x32xf32>
    %150 = vector.shape_cast %140 : vector<8x32xf32> to vector<1x8x32xf32>
    tpu.vector_store %arg8[%147, %c0_57, %c0_58], %150 {strides = array<i32>} : memref<8x8x32xf32, #tpu.memory_space<vmem>>, vector<1x8x32xf32>,
    %c4_i32 = arith.constant 4 : i32
    %c8_i32_59 = arith.constant 8 : i32
    %151 = arith.muli %c4_i32, %c8_i32_59 : i32
    %152 = arith.index_cast %151 : i32 to index
    %c0_60 = arith.constant 0 : index
    %153 = vector.load %arg9[%152, %c0_60] : memref<64x96xf32, #tpu.memory_space<vmem>>, vector<8x96xf32>
    %c0_61 = arith.constant 0 : index
    %c0_62 = arith.constant 0 : index
    %154 = vector.load %arg3[%c0_61, %c0_62] : memref<32x96xf32, #tpu.memory_space<vmem>>, vector<32x96xf32>
    %cst_63 = arith.constant dense<0.000000e+00> : vector<8x96xf32>
    %155 = tpu.matmul %142, %154, %cst_63 {dimension_numbers = #tpu.dot_dimension_numbers<[1], [0], [0], [1], [0, 0, 1, 1], [], []>} : vector<8x32xf32>, vector<32x96xf32>, vector<8x96xf32> -> vector<8x96xf32>
    %156 = arith.addf %153, %155 : vector<8x96xf32>
    %157 = vector.extract_strided_slice %156 {offsets = [0, 0], sizes = [8, 32], strides = [1, 1]} : vector<8x96xf32> to vector<8x32xf32>
    %158 = arith.negf %157 : vector<8x32xf32>
    %159 = math.exp %158 : vector<8x32xf32>
    %cst_64 = arith.constant 1.000000e+00 : f32
    %160 = vector.broadcast %cst_64 : f32 to vector<8x32xf32>
    %161 = arith.addf %160, %159 : vector<8x32xf32>
    %162 = arith.divf %160, %161 : vector<8x32xf32>
    %163 = vector.extract_strided_slice %156 {offsets = [0, 32], sizes = [8, 32], strides = [1, 1]} : vector<8x96xf32> to vector<8x32xf32>
    %164 = arith.negf %163 : vector<8x32xf32>
    %165 = math.exp %164 : vector<8x32xf32>
    %cst_65 = arith.constant 1.000000e+00 : f32
    %166 = vector.broadcast %cst_65 : f32 to vector<8x32xf32>
    %167 = arith.addf %166, %165 : vector<8x32xf32>
    %168 = arith.divf %166, %167 : vector<8x32xf32>
    %169 = vector.extract_strided_slice %156 {offsets = [0, 64], sizes = [8, 32], strides = [1, 1]} : vector<8x96xf32> to vector<8x32xf32>
    %170 = math.tanh %169 : vector<8x32xf32>
    %171 = arith.mulf %162, %140 : vector<8x32xf32>
    %172 = arith.mulf %17, %170 : vector<8x32xf32>
    %173 = arith.addf %171, %172 : vector<8x32xf32>
    %174 = math.tanh %173 : vector<8x32xf32>
    %175 = arith.mulf %168, %174 : vector<8x32xf32>
    %176 = arith.index_cast %c4_i32 : i32 to index
    %c0_66 = arith.constant 0 : index
    %c0_67 = arith.constant 0 : index
    %177 = vector.load %arg7[%176, %c0_66, %c0_67] : memref<8x8x32xf32, #tpu.memory_space<vmem>>, vector<1x8x32xf32>
    %178 = vector.shape_cast %177 : vector<1x8x32xf32> to vector<8x32xf32>
    %179 = vector.shape_cast %175 : vector<8x32xf32> to vector<1x8x32xf32>
    tpu.vector_store %arg7[%176, %c0_66, %c0_67], %179 {strides = array<i32>} : memref<8x8x32xf32, #tpu.memory_space<vmem>>, vector<1x8x32xf32>,
    %180 = arith.index_cast %c4_i32 : i32 to index
    %c0_68 = arith.constant 0 : index
    %c0_69 = arith.constant 0 : index
    %181 = vector.load %arg8[%180, %c0_68, %c0_69] : memref<8x8x32xf32, #tpu.memory_space<vmem>>, vector<1x8x32xf32>
    %182 = vector.shape_cast %181 : vector<1x8x32xf32> to vector<8x32xf32>
    %183 = vector.shape_cast %173 : vector<8x32xf32> to vector<1x8x32xf32>
    tpu.vector_store %arg8[%180, %c0_68, %c0_69], %183 {strides = array<i32>} : memref<8x8x32xf32, #tpu.memory_space<vmem>>, vector<1x8x32xf32>,
    %c5_i32 = arith.constant 5 : i32
    %c8_i32_70 = arith.constant 8 : i32
    %184 = arith.muli %c5_i32, %c8_i32_70 : i32
    %185 = arith.index_cast %184 : i32 to index
    %c0_71 = arith.constant 0 : index
    %186 = vector.load %arg9[%185, %c0_71] : memref<64x96xf32, #tpu.memory_space<vmem>>, vector<8x96xf32>
    %c0_72 = arith.constant 0 : index
    %c0_73 = arith.constant 0 : index
    %187 = vector.load %arg3[%c0_72, %c0_73] : memref<32x96xf32, #tpu.memory_space<vmem>>, vector<32x96xf32>
    %cst_74 = arith.constant dense<0.000000e+00> : vector<8x96xf32>
    %188 = tpu.matmul %175, %187, %cst_74 {dimension_numbers = #tpu.dot_dimension_numbers<[1], [0], [0], [1], [0, 0, 1, 1], [], []>} : vector<8x32xf32>, vector<32x96xf32>, vector<8x96xf32> -> vector<8x96xf32>
    %189 = arith.addf %186, %188 : vector<8x96xf32>
    %190 = vector.extract_strided_slice %189 {offsets = [0, 0], sizes = [8, 32], strides = [1, 1]} : vector<8x96xf32> to vector<8x32xf32>
    %191 = arith.negf %190 : vector<8x32xf32>
    %192 = math.exp %191 : vector<8x32xf32>
    %cst_75 = arith.constant 1.000000e+00 : f32
    %193 = vector.broadcast %cst_75 : f32 to vector<8x32xf32>
    %194 = arith.addf %193, %192 : vector<8x32xf32>
    %195 = arith.divf %193, %194 : vector<8x32xf32>
    %196 = vector.extract_strided_slice %189 {offsets = [0, 32], sizes = [8, 32], strides = [1, 1]} : vector<8x96xf32> to vector<8x32xf32>
    %197 = arith.negf %196 : vector<8x32xf32>
    %198 = math.exp %197 : vector<8x32xf32>
    %cst_76 = arith.constant 1.000000e+00 : f32
    %199 = vector.broadcast %cst_76 : f32 to vector<8x32xf32>
    %200 = arith.addf %199, %198 : vector<8x32xf32>
    %201 = arith.divf %199, %200 : vector<8x32xf32>
    %202 = vector.extract_strided_slice %189 {offsets = [0, 64], sizes = [8, 32], strides = [1, 1]} : vector<8x96xf32> to vector<8x32xf32>
    %203 = math.tanh %202 : vector<8x32xf32>
    %204 = arith.mulf %195, %173 : vector<8x32xf32>
    %205 = arith.mulf %17, %203 : vector<8x32xf32>
    %206 = arith.addf %204, %205 : vector<8x32xf32>
    %207 = math.tanh %206 : vector<8x32xf32>
    %208 = arith.mulf %201, %207 : vector<8x32xf32>
    %209 = arith.index_cast %c5_i32 : i32 to index
    %c0_77 = arith.constant 0 : index
    %c0_78 = arith.constant 0 : index
    %210 = vector.load %arg7[%209, %c0_77, %c0_78] : memref<8x8x32xf32, #tpu.memory_space<vmem>>, vector<1x8x32xf32>
    %211 = vector.shape_cast %210 : vector<1x8x32xf32> to vector<8x32xf32>
    %212 = vector.shape_cast %208 : vector<8x32xf32> to vector<1x8x32xf32>
    tpu.vector_store %arg7[%209, %c0_77, %c0_78], %212 {strides = array<i32>} : memref<8x8x32xf32, #tpu.memory_space<vmem>>, vector<1x8x32xf32>,
    %213 = arith.index_cast %c5_i32 : i32 to index
    %c0_79 = arith.constant 0 : index
    %c0_80 = arith.constant 0 : index
    %214 = vector.load %arg8[%213, %c0_79, %c0_80] : memref<8x8x32xf32, #tpu.memory_space<vmem>>, vector<1x8x32xf32>
    %215 = vector.shape_cast %214 : vector<1x8x32xf32> to vector<8x32xf32>
    %216 = vector.shape_cast %206 : vector<8x32xf32> to vector<1x8x32xf32>
    tpu.vector_store %arg8[%213, %c0_79, %c0_80], %216 {strides = array<i32>} : memref<8x8x32xf32, #tpu.memory_space<vmem>>, vector<1x8x32xf32>,
    %c6_i32 = arith.constant 6 : i32
    %c8_i32_81 = arith.constant 8 : i32
    %217 = arith.muli %c6_i32, %c8_i32_81 : i32
    %218 = arith.index_cast %217 : i32 to index
    %c0_82 = arith.constant 0 : index
    %219 = vector.load %arg9[%218, %c0_82] : memref<64x96xf32, #tpu.memory_space<vmem>>, vector<8x96xf32>
    %c0_83 = arith.constant 0 : index
    %c0_84 = arith.constant 0 : index
    %220 = vector.load %arg3[%c0_83, %c0_84] : memref<32x96xf32, #tpu.memory_space<vmem>>, vector<32x96xf32>
    %cst_85 = arith.constant dense<0.000000e+00> : vector<8x96xf32>
    %221 = tpu.matmul %208, %220, %cst_85 {dimension_numbers = #tpu.dot_dimension_numbers<[1], [0], [0], [1], [0, 0, 1, 1], [], []>} : vector<8x32xf32>, vector<32x96xf32>, vector<8x96xf32> -> vector<8x96xf32>
    %222 = arith.addf %219, %221 : vector<8x96xf32>
    %223 = vector.extract_strided_slice %222 {offsets = [0, 0], sizes = [8, 32], strides = [1, 1]} : vector<8x96xf32> to vector<8x32xf32>
    %224 = arith.negf %223 : vector<8x32xf32>
    %225 = math.exp %224 : vector<8x32xf32>
    %cst_86 = arith.constant 1.000000e+00 : f32
    %226 = vector.broadcast %cst_86 : f32 to vector<8x32xf32>
    %227 = arith.addf %226, %225 : vector<8x32xf32>
    %228 = arith.divf %226, %227 : vector<8x32xf32>
    %229 = vector.extract_strided_slice %222 {offsets = [0, 32], sizes = [8, 32], strides = [1, 1]} : vector<8x96xf32> to vector<8x32xf32>
    %230 = arith.negf %229 : vector<8x32xf32>
    %231 = math.exp %230 : vector<8x32xf32>
    %cst_87 = arith.constant 1.000000e+00 : f32
    %232 = vector.broadcast %cst_87 : f32 to vector<8x32xf32>
    %233 = arith.addf %232, %231 : vector<8x32xf32>
    %234 = arith.divf %232, %233 : vector<8x32xf32>
    %235 = vector.extract_strided_slice %222 {offsets = [0, 64], sizes = [8, 32], strides = [1, 1]} : vector<8x96xf32> to vector<8x32xf32>
    %236 = math.tanh %235 : vector<8x32xf32>
    %237 = arith.mulf %228, %206 : vector<8x32xf32>
    %238 = arith.mulf %17, %236 : vector<8x32xf32>
    %239 = arith.addf %237, %238 : vector<8x32xf32>
    %240 = math.tanh %239 : vector<8x32xf32>
    %241 = arith.mulf %234, %240 : vector<8x32xf32>
    %242 = arith.index_cast %c6_i32 : i32 to index
    %c0_88 = arith.constant 0 : index
    %c0_89 = arith.constant 0 : index
    %243 = vector.load %arg7[%242, %c0_88, %c0_89] : memref<8x8x32xf32, #tpu.memory_space<vmem>>, vector<1x8x32xf32>
    %244 = vector.shape_cast %243 : vector<1x8x32xf32> to vector<8x32xf32>
    %245 = vector.shape_cast %241 : vector<8x32xf32> to vector<1x8x32xf32>
    tpu.vector_store %arg7[%242, %c0_88, %c0_89], %245 {strides = array<i32>} : memref<8x8x32xf32, #tpu.memory_space<vmem>>, vector<1x8x32xf32>,
    %246 = arith.index_cast %c6_i32 : i32 to index
    %c0_90 = arith.constant 0 : index
    %c0_91 = arith.constant 0 : index
    %247 = vector.load %arg8[%246, %c0_90, %c0_91] : memref<8x8x32xf32, #tpu.memory_space<vmem>>, vector<1x8x32xf32>
    %248 = vector.shape_cast %247 : vector<1x8x32xf32> to vector<8x32xf32>
    %249 = vector.shape_cast %239 : vector<8x32xf32> to vector<1x8x32xf32>
    tpu.vector_store %arg8[%246, %c0_90, %c0_91], %249 {strides = array<i32>} : memref<8x8x32xf32, #tpu.memory_space<vmem>>, vector<1x8x32xf32>,
    %c7_i32 = arith.constant 7 : i32
    %c8_i32_92 = arith.constant 8 : i32
    %250 = arith.muli %c7_i32, %c8_i32_92 : i32
    %251 = arith.index_cast %250 : i32 to index
    %c0_93 = arith.constant 0 : index
    %252 = vector.load %arg9[%251, %c0_93] : memref<64x96xf32, #tpu.memory_space<vmem>>, vector<8x96xf32>
    %c0_94 = arith.constant 0 : index
    %c0_95 = arith.constant 0 : index
    %253 = vector.load %arg3[%c0_94, %c0_95] : memref<32x96xf32, #tpu.memory_space<vmem>>, vector<32x96xf32>
    %cst_96 = arith.constant dense<0.000000e+00> : vector<8x96xf32>
    %254 = tpu.matmul %241, %253, %cst_96 {dimension_numbers = #tpu.dot_dimension_numbers<[1], [0], [0], [1], [0, 0, 1, 1], [], []>} : vector<8x32xf32>, vector<32x96xf32>, vector<8x96xf32> -> vector<8x96xf32>
    %255 = arith.addf %252, %254 : vector<8x96xf32>
    %256 = vector.extract_strided_slice %255 {offsets = [0, 0], sizes = [8, 32], strides = [1, 1]} : vector<8x96xf32> to vector<8x32xf32>
    %257 = arith.negf %256 : vector<8x32xf32>
    %258 = math.exp %257 : vector<8x32xf32>
    %cst_97 = arith.constant 1.000000e+00 : f32
    %259 = vector.broadcast %cst_97 : f32 to vector<8x32xf32>
    %260 = arith.addf %259, %258 : vector<8x32xf32>
    %261 = arith.divf %259, %260 : vector<8x32xf32>
    %262 = vector.extract_strided_slice %255 {offsets = [0, 32], sizes = [8, 32], strides = [1, 1]} : vector<8x96xf32> to vector<8x32xf32>
    %263 = arith.negf %262 : vector<8x32xf32>
    %264 = math.exp %263 : vector<8x32xf32>
    %cst_98 = arith.constant 1.000000e+00 : f32
    %265 = vector.broadcast %cst_98 : f32 to vector<8x32xf32>
    %266 = arith.addf %265, %264 : vector<8x32xf32>
    %267 = arith.divf %265, %266 : vector<8x32xf32>
    %268 = vector.extract_strided_slice %255 {offsets = [0, 64], sizes = [8, 32], strides = [1, 1]} : vector<8x96xf32> to vector<8x32xf32>
    %269 = math.tanh %268 : vector<8x32xf32>
    %270 = arith.mulf %261, %239 : vector<8x32xf32>
    %271 = arith.mulf %17, %269 : vector<8x32xf32>
    %272 = arith.addf %270, %271 : vector<8x32xf32>
    %273 = math.tanh %272 : vector<8x32xf32>
    %274 = arith.mulf %267, %273 : vector<8x32xf32>
    %275 = arith.index_cast %c7_i32 : i32 to index
    %c0_99 = arith.constant 0 : index
    %c0_100 = arith.constant 0 : index
    %276 = vector.load %arg7[%275, %c0_99, %c0_100] : memref<8x8x32xf32, #tpu.memory_space<vmem>>, vector<1x8x32xf32>
    %277 = vector.shape_cast %276 : vector<1x8x32xf32> to vector<8x32xf32>
    %278 = vector.shape_cast %274 : vector<8x32xf32> to vector<1x8x32xf32>
    tpu.vector_store %arg7[%275, %c0_99, %c0_100], %278 {strides = array<i32>} : memref<8x8x32xf32, #tpu.memory_space<vmem>>, vector<1x8x32xf32>,
    %279 = arith.index_cast %c7_i32 : i32 to index
    %c0_101 = arith.constant 0 : index
    %c0_102 = arith.constant 0 : index
    %280 = vector.load %arg8[%279, %c0_101, %c0_102] : memref<8x8x32xf32, #tpu.memory_space<vmem>>, vector<1x8x32xf32>
    %281 = vector.shape_cast %280 : vector<1x8x32xf32> to vector<8x32xf32>
    %282 = vector.shape_cast %272 : vector<8x32xf32> to vector<1x8x32xf32>
    tpu.vector_store %arg8[%279, %c0_101, %c0_102], %282 {strides = array<i32>} : memref<8x8x32xf32, #tpu.memory_space<vmem>>, vector<1x8x32xf32>,
    %c8_i32_103 = arith.constant 8 : i32
    return
  }
}

</mosaic_0001>

<bundles_post_ra>
// kernel: ealstm_forward.1
= control target key start
LH: loop header
LB: loop body
LE: loop exit
PB: predicated region body
PF: predicated region fallthrough
CT: control target
= control target key end

     0   :  { %vm69_vm0 = vcmask 1044480   ;;  %vm44_vm1 = vcmask 39936   ;;  %vm200_vm2 = vcmask 1043456   ;;  %v1412_v6 = vmov 0.0   ;;  %s1415_s14 = smov 32   ;;  %s1736_s2 = inlined_call_operand.vmem [shape: f32[5,96], index: 2, kind: input, shape index: {}]   ;;  %s1737_s0 = inlined_call_operand.vmem [shape: f32[64,5], index: 0, kind: input, shape index: {}]   ;;  %s1738_s4 = inlined_call_operand.vmem [shape: f32[4,32], index: 4, kind: input, shape index: {}]   ;;  %s1739_s1 = inlined_call_operand.vmem [shape: f32[8,4], index: 1, kind: input, shape index: {}]   ;;  %s1740_s3 = inlined_call_operand.vmem [shape: f32[32,96], index: 3, kind: input, shape index: {}]   ;;  %s1741_s5 = inlined_call_operand.vmem [shape: f32[1,96], index: 5, kind: input, shape index: {}]   ;;  %s1742_s6 = inlined_call_operand.vmem [shape: f32[1,32], index: 6, kind: input, shape index: {}]   ;;  %s1743_s8 = inlined_call_operand.vmem [shape: f32[8,8,32], index: 8, kind: output, shape index: {1}]   ;;  %s1744_s7 = inlined_call_operand.vmem [shape: f32[8,8,32], index: 7, kind: output, shape index: {0}]  }
   0x1   :  { %v36_v0 = vld [vmem:[%s1736_s2] sm:$0x1f]  ;;  %v34_v2 = vld [vmem:[%s1737_s0 + $0x30] sm:$0xff]  ;;  %v29_v3 = vld [vmem:[%s1737_s0 + $0x8] sm:$0xff]  ;;  %vm1413_vm3 = vmmov 0   ;;  %vm196_vm4 = vcmask 31744  }
   0x2   :  { %v28_v1 = vld [vmem:[%s1737_s0] sm:$0xff]  ;;  %1230 = vmatprep.subr.msk.mxu0 %vm69_vm0, %v36_v0  ;;  %1337 = vmatprep.subr.msk.mxu1 %vm69_vm0, %v36_v0  ;;  %v35_v4 = vld [vmem:[%s1737_s0 + $0x38] sm:$0xff]  ;;  %v1501_v9 = vld [vmem:[%s1740_s3 + $0x10] sm:$0xff]  ;;  %vm178_vm5 = vcmask 785408   ;;  %vm285_vm6 = vcmask 261120   ;;  %s1416_s2 = smov 96  }
   0x3   :  { %1231 = vmatpush3.msk.msra.mxu0 %vm69_vm0, %v36_v0  ;;  %1338 = vmatpush3.msk.msra.mxu1 %vm69_vm0, %v36_v0  ;;  %v188_v5 = vld [vmem:[%s1738_s4] sm:$0xf]  ;;  %v1493_v8 = vld [vmem:[%s1740_s3 + $0x18] sm:$0xff]  ;;  %v1511_v10 = vld [vmem:[%s1740_s3 + $0x8] sm:$0xff] }
   0x4   :  { %1232 = vmatprep.mubr.msk.f32.mxu0 %vm44_vm1, %v28_v1  ;;  %1241 = vmatprep.mubr.msk.f32.mxu1 %vm44_vm1, %v34_v2  ;;  %v187_v7 = vld [vmem:[%s1739_s1] sm:$0xff]  ;;  %v30_v42 = vld [vmem:[%s1737_s0 + $0x10] sm:$0xff]  ;;  %v31_v43 = vld [vmem:[%s1737_s0 + $0x18] sm:$0xff] }
   0x5   :  { %1233 = vmatmul.mubr.msk.f32.vlgmr.msra.gmra.mxu0 %vm44_vm1, %v29_v3  ;;  %1242 = vmatmul.mubr.msk.f32.vlgmr.msra.gmra.mxu1 %vm44_vm1, %v35_v4  ;;  %v1520_v11 = vld [vmem:[%s1740_s3] sm:$0xff]  ;;  %v33_v45 = vld [vmem:[%s1737_s0 + $0x28] sm:$0xff] }
   0x6   :  { %1244 = vmatprep.subr.mxu1 %v1412_v6  ;;  %1246 = vmatprep.mubr.msk.f32.mxu1 %vm1413_vm3, %v1412_v6  ;;  %v1544_v12 = vld [vmem:[%s1741_s5] ss:$0 sm:$0xff]  ;;  %s1414_s5 = smov 64  }
   0x7   :  { %1245 = vmatpush3.msk.msra.mxu1 %vm200_vm2, %v188_v5  ;;  %1260 = vmatprep.subr.mxu0 %v1412_v6  ;;  %v1146_v28 = vld [vmem:[%s1742_s6] ss:$0 sm:$0xff] }
   0x8   :  { %1249 = vmatprep.subr.mxu1 %v1412_v6  ;;  %1261 = vmatpush3.msra.mxu0 %v1493_v8  ;;  %v32_v44 = vld [vmem:[%s1737_s0 + $0x20] sm:$0xff] }
   0x9   :  { %1247 = vmatmul.mubr.msk.f32.vlgmr.msra.gmra.mxu1 %vm196_vm4, %v187_v7  ;;  %1262 = vmatprep.subr.mxu0 %v1412_v6 }
   0xa   :  { %1250 = vmatpush3.msra.mxu1 %v1493_v8  ;;  %1257 = vmatprep.mubr.msk.f32.mxu1 %vm1413_vm3, %v1412_v6 }
   0xb   :  { %1251 = vmatprep.subr.mxu1 %v1412_v6  ;;  %1263 = vmatpush3.msra.mxu0 %v1501_v9 }
   0xc   :  { %1252 = vmatpush3.msra.mxu1 %v1501_v9  ;;  %1264 = vmatprep.subr.mxu0 %v1412_v6 }
   0xd   :  { %1253 = vmatprep.subr.mxu1 %v1412_v6  ;;  %1265 = vmatpush3.msra.mxu0 %v1511_v10 }
   0xe   :  { %1254 = vmatpush3.msra.mxu1 %v1511_v10  ;;  %1266 = vmatprep.subr.mxu0 %v1412_v6 }
   0xf   :  { %1255 = vmatprep.subr.mxu1 %v1412_v6  ;;  %1267 = vmatpush3.msra.mxu0 %v1520_v11 }
  0x10   :  { %1256 = vmatpush3.msra.mxu1 %v1520_v11  ;;  %1282 = vmatprep.subr.mxu0 %v1412_v6 }
  0x11   :  { %1258 = vmatmul.mubr.f32.vlgmr.msra.gmra.mxu1 %v1412_v6  ;;  %1271 = vmatprep.subr.mxu1 %v1412_v6 }
  0x12   :  { %1272 = vmatpush3.msra.mxu1 %v1493_v8  ;;  %1279 = vmatprep.mubr.msk.f32.mxu1 %vm1413_vm3, %v1412_v6 }
  0x13   :  { %1273 = vmatprep.subr.mxu1 %v1412_v6  ;;  %1235 = vmatprep.mubr.msk.f32.mxu0 %vm44_vm1, %v30_v42 }
  0x14   :  { %1274 = vmatpush3.msra.mxu1 %v1501_v9  ;;  %1236 = vmatmul.mubr.msk.f32.gmra.mxu0 %vm44_vm1, %v31_v43 }
  0x15   :  { %1275 = vmatprep.subr.mxu1 %v1412_v6  ;;  %1238 = vmatprep.mubr.msk.f32.mxu0 %vm44_vm1, %v32_v44 }
  0x16   :  { %1276 = vmatpush3.msra.mxu1 %v1511_v10 }
  0x17   :  { %1277 = vmatprep.subr.mxu1 %v1412_v6 }
  0x18   :  { %1278 = vmatpush3.msra.mxu1 %v1520_v11  ;;  %1239 = vmatmul.mubr.msk.f32.gmra.mxu0 %vm44_vm1, %v33_v45 }
  0x19   :  { %1293 = vmatprep.subr.mxu1 %v1412_v6  ;;  %1268 = vmatprep.mubr.msk.f32.mxu0 %vm1413_vm3, %v1412_v6 }
  0xc5   :  { %v1234_v13 = vpop.f32.mrf.mxu0  ;;  %v1243_v14 = vpop.f32.mrf.mxu1 }
  0xc6   :  { %v145_v15 = vadd.f32 %v1234_v13, %v1544_v12  ;;  %v175_v16 = vadd.f32 %v1243_v14, %v1544_v12 }
  0xc7   :  { %v139_v17 = vpop.f32.mrf.mxu0  ;;  %v169_v18 = vpop.f32.mrf.mxu1 }
  0xc8   :  { %180 = vst.msk [vmem:[#allocation2 + $0x8] sm:$0xff] %vm178_vm5, %v145_v15  ;;  %186 = vst.msk [vmem:[#allocation2 + $0x38] sm:$0xff] %vm178_vm5, %v175_v16  ;;  %v140_v19 = vadd.f32 %v1544_v12, %v139_v17  ;;  %v170_v20 = vadd.f32 %v1544_v12, %v169_v18 }
  0xc9   :  { %v270_v21 = vpop.f32.mrf.mxu1 }
  0xca   :  { %179 = vst.msk [vmem:[#allocation2] sm:$0xff] %vm178_vm5, %v140_v19  ;;  %185 = vst.msk [vmem:[#allocation2 + $0x30] sm:$0xff] %vm178_vm5, %v170_v20  ;;  %v271_v29 = vadd.f32 %v1146_v28, %v270_v21 }
  0xcb   :  { %v1248_v22 = vpop.f32.mrf.mxu1 }
  0xcc   :  { %v1149_v31 = vmul.f32 -1.442695, %v271_v29 }
  0xcf   :  { %v386_v58 = vld [vmem:[#allocation2 + $0x8] sm:$0xff] }
  0xd1   :  { %v280_v23 = vld [vmem:[#allocation2] sm:$0xff]  ;;  %v355_v24 = vpop.f32.mrf.mxu1 }
  0xd2   :  { %v359_v25 = vadd.f32 %v355_v24, %v280_v23 }
  0xd3   :  { %v1259_v26 = vpop.f32.mrf.mxu1 }
  0xd4   :  { %1344 = vtanh.f32 %v359_v25  ;;  %v1150_v30 = vmul.f32 -1.442695, %v359_v25  ;;  %v1237_v49 = vpop.f32.mrf.mxu0 }
  0xd5   :  { %v155_v50 = vadd.f32 %v1237_v49, %v1544_v12 }
  0xd6   :  { %1346 = vpow2.f32 %v1150_v30  ;;  %v149_v51 = vpop.f32.mrf.mxu0 }
  0xd7   :  { %1348 = vpow2.f32 %v1149_v31  ;;  %182 = vst.msk [vmem:[#allocation2 + $0x18] sm:$0xff] %vm178_vm5, %v155_v50  ;;  %v150_v52 = vadd.f32 %v1544_v12, %v149_v51 }
  0xd8   :  { %v1240_v53 = vpop.f32.mrf.mxu0 }
  0xd9   :  { %181 = vst.msk [vmem:[#allocation2 + $0x10] sm:$0xff] %vm178_vm5, %v150_v52  ;;  %v165_v54 = vadd.f32 %v1240_v53, %v1544_v12 }
  0xda   :  { %v159_v55 = vpop.f32.mrf.mxu0 }
  0xdb   :  { %184 = vst.msk [vmem:[#allocation2 + $0x28] sm:$0xff] %vm178_vm5, %v165_v54  ;;  %v160_v56 = vadd.f32 %v1544_v12, %v159_v55 }
  0xdd   :  { %183 = vst.msk [vmem:[#allocation2 + $0x20] sm:$0xff] %vm178_vm5, %v160_v56 }
  0xe0   :  { %v492_v16 = vld [vmem:[#allocation2 + $0x10] sm:$0xff] }
  0xe1   :  { %v1345_v27 = vpop.eup %1344 }
  0xe2   :  { %369 = vrot.lane.b32.xlu0 %v1345_v27, %s1414_s5 }
  0xe3   :  { %v1347_v32 = vpop.eup %1346 }
  0xe4   :  { %v1349_v33 = vpop.eup %1348  ;;  %v363_v34 = vadd.f32 1.0, %v1347_v32  ;;  %v704_v51 = vld [vmem:[#allocation2 + $0x20] sm:$0xff] }
  0xe5   :  { %v277_v35 = vadd.f32 1.0, %v1349_v33  ;;  %v598_v33 = vld [vmem:[#allocation2 + $0x18] sm:$0xff] }
  0xe6   :  { %1350 = vrcp.f32 %v363_v34 }
  0xe7   :  { %1352 = vrcp.f32 %v277_v35 }
  0xf3   :  { %v1351_v36 = vpop.eup %1350 }
  0xf4   :  { %v1558_v37 = vpop.eup %1352  ;;  %v367_v39 = vmul.f32 0.0, %v1351_v36 }
 0x154   :  { %v370_v38 = vpop.permute.xlu0 %369 }
 0x155   :  { %v372_v40 = vmul.f32 %v1558_v37, %v370_v38 }
 0x157   :  { %v373_v41 = vadd.f32 %v372_v40, %v367_v39 }
 0x159   :  { %1354 = vtanh.f32 %v373_v41  ;;  %385 = vst.msk [vmem:[%s1743_s8] sm:$0xff] %vm285_vm6, %v373_v41 }
 0x166   :  { %v1355_v46 = vpop.eup %1354 }
 0x167   :  { %376 = vrot.lane.b32.xlu0 %v1355_v46, %s1415_s14 }
 0x1d9   :  { %v377_v47 = vpop.permute.xlu0 %376 }
 0x1da   :  { %v379_v48 = vmul.f32 %v1351_v36, %v377_v47 }
 0x1dc   :  { %381 = vrot.lane.b32.xlu1 %v379_v48, %s1416_s2 }
 0x24e   :  { %v382_v57 = vpop.permute.xlu1 %381 }
 0x24f   :  { %384 = vst.msk [vmem:[%s1744_s7] sm:$0xff] %vm285_vm6, %v382_v57  ;;  %1269 = vmatmul.mubr.msk.f32.vlgmr.msra.gmra.mxu0 %vm285_vm6, %v382_v57 }
 0x250   :  { %1283 = vmatpush3.msra.mxu0 %v1493_v8  ;;  %1290 = vmatprep.mubr.msk.f32.mxu0 %vm1413_vm3, %v1412_v6 }
 0x251   :  { %1284 = vmatprep.subr.mxu0 %v1412_v6 }
 0x252   :  { %1285 = vmatpush3.msra.mxu0 %v1501_v9 }
 0x253   :  { %1286 = vmatprep.subr.mxu0 %v1412_v6 }
 0x254   :  { %1287 = vmatpush3.msra.mxu0 %v1511_v10 }
 0x255   :  { %1288 = vmatprep.subr.mxu0 %v1412_v6 }
 0x256   :  { %1289 = vmatpush3.msra.mxu0 %v1520_v11 }
 0x257   :  { %1304 = vmatprep.subr.mxu0 %v1412_v6 }
 0x30f   :  { %v459_v59 = vpop.f32.mrf.mxu0 }
 0x310   :  { %v463_v60 = vadd.f32 %v459_v59, %v386_v58 }
 0x311   :  { %v1270_v61 = vpop.f32.mrf.mxu0 }
 0x312   :  { %1356 = vtanh.f32 %v463_v60  ;;  %v1152_v63 = vmul.f32 -1.442695, %v463_v60 }
 0x314   :  { %1358 = vpow2.f32 %v1152_v63 }
 0x31f   :  { %v1357_v62 = vpop.eup %1356 }
 0x320   :  { %473 = vrot.lane.b32.xlu1 %v1357_v62, %s1414_s5 }
 0x321   :  { %v1359_v0 = vpop.eup %1358 }
 0x322   :  { %v467_v1 = vadd.f32 1.0, %v1359_v0 }
 0x324   :  { %1360 = vrcp.f32 %v467_v1 }
 0x331   :  { %v1361_v2 = vpop.eup %1360 }
 0x332   :  { %v471_v4 = vmul.f32 %v1361_v2, %v373_v41 }
 0x392   :  { %v474_v3 = vpop.permute.xlu1 %473 }
 0x393   :  { %v476_v5 = vmul.f32 %v1558_v37, %v474_v3 }
 0x395   :  { %v477_v7 = vadd.f32 %v476_v5, %v471_v4  ;;  %v810_v4 = vld [vmem:[#allocation2 + $0x28] sm:$0xff] }
 0x397   :  { %1362 = vtanh.f32 %v477_v7  ;;  %1154 = vst.msk [vmem:[%s1743_s8 + $0x8] sm:$0xff] %vm285_vm6, %v477_v7 }
 0x3a4   :  { %v1363_v12 = vpop.eup %1362 }
 0x3a5   :  { %480 = vrot.lane.b32.xlu0 %v1363_v12, %s1415_s14 }
 0x417   :  { %v481_v13 = vpop.permute.xlu0 %480 }
 0x418   :  { %v483_v14 = vmul.f32 %v1361_v2, %v481_v13 }
 0x41a   :  { %485 = vrot.lane.b32.xlu1 %v483_v14, %s1416_s2 }
 0x48c   :  { %v486_v15 = vpop.permute.xlu1 %485 }
 0x48d   :  { %1153 = vst.msk [vmem:[%s1744_s7 + $0x8] sm:$0xff] %vm285_vm6, %v486_v15  ;;  %1280 = vmatmul.mubr.msk.f32.vlgmr.msra.gmra.mxu1 %vm285_vm6, %v486_v15 }
 0x48e   :  { %1294 = vmatpush3.msra.mxu1 %v1493_v8  ;;  %1301 = vmatprep.mubr.msk.f32.mxu1 %vm1413_vm3, %v1412_v6 }
 0x48f   :  { %1295 = vmatprep.subr.mxu1 %v1412_v6 }
 0x490   :  { %1296 = vmatpush3.msra.mxu1 %v1501_v9 }
 0x491   :  { %1297 = vmatprep.subr.mxu1 %v1412_v6 }
 0x492   :  { %1298 = vmatpush3.msra.mxu1 %v1511_v10 }
 0x493   :  { %1299 = vmatprep.subr.mxu1 %v1412_v6 }
 0x494   :  { %1300 = vmatpush3.msra.mxu1 %v1520_v11 }
 0x495   :  { %1315 = vmatprep.subr.mxu1 %v1412_v6 }
 0x54d   :  { %v565_v17 = vpop.f32.mrf.mxu1 }
 0x54e   :  { %v569_v18 = vadd.f32 %v565_v17, %v492_v16 }
 0x54f   :  { %v1281_v19 = vpop.f32.mrf.mxu1 }
 0x550   :  { %1364 = vtanh.f32 %v569_v18  ;;  %v1156_v21 = vmul.f32 -1.442695, %v569_v18 }
 0x552   :  { %1366 = vpow2.f32 %v1156_v21  ;;  %v916_v21 = vld [vmem:[#allocation2 + $0x30] sm:$0xff] }
 0x55d   :  { %v1365_v20 = vpop.eup %1364 }
 0x55e   :  { %579 = vrot.lane.b32.xlu0 %v1365_v20, %s1414_s5 }
 0x55f   :  { %v1367_v22 = vpop.eup %1366 }
 0x560   :  { %v573_v23 = vadd.f32 1.0, %v1367_v22 }
 0x562   :  { %1368 = vrcp.f32 %v573_v23 }
 0x56f   :  { %v1369_v24 = vpop.eup %1368 }
 0x570   :  { %v577_v26 = vmul.f32 %v1369_v24, %v477_v7 }
 0x5d0   :  { %v580_v25 = vpop.permute.xlu0 %579 }
 0x5d1   :  { %v582_v27 = vmul.f32 %v1558_v37, %v580_v25 }
 0x5d3   :  { %v583_v28 = vadd.f32 %v582_v27, %v577_v26 }
 0x5d5   :  { %1370 = vtanh.f32 %v583_v28  ;;  %1158 = vst.msk [vmem:[%s1743_s8 + $0x10] sm:$0xff] %vm285_vm6, %v583_v28 }
 0x5e2   :  { %v1371_v29 = vpop.eup %1370 }
 0x5e3   :  { %586 = vrot.lane.b32.xlu1 %v1371_v29, %s1415_s14 }
 0x655   :  { %v587_v30 = vpop.permute.xlu1 %586 }
 0x656   :  { %v589_v31 = vmul.f32 %v1369_v24, %v587_v30 }
 0x658   :  { %591 = vrot.lane.b32.xlu0 %v589_v31, %s1416_s2 }
 0x6ca   :  { %v592_v32 = vpop.permute.xlu0 %591 }
 0x6cb   :  { %1157 = vst.msk [vmem:[%s1744_s7 + $0x10] sm:$0xff] %vm285_vm6, %v592_v32  ;;  %1291 = vmatmul.mubr.msk.f32.vlgmr.msra.gmra.mxu0 %vm285_vm6, %v592_v32 }
 0x6cc   :  { %1305 = vmatpush3.msra.mxu0 %v1493_v8  ;;  %1312 = vmatprep.mubr.msk.f32.mxu0 %vm1413_vm3, %v1412_v6 }
 0x6cd   :  { %1306 = vmatprep.subr.mxu0 %v1412_v6 }
 0x6ce   :  { %1307 = vmatpush3.msra.mxu0 %v1501_v9 }
 0x6cf   :  { %1308 = vmatprep.subr.mxu0 %v1412_v6 }
 0x6d0   :  { %1309 = vmatpush3.msra.mxu0 %v1511_v10 }
 0x6d1   :  { %1310 = vmatprep.subr.mxu0 %v1412_v6 }
 0x6d2   :  { %1311 = vmatpush3.msra.mxu0 %v1520_v11 }
 0x6d3   :  { %1326 = vmatprep.subr.mxu0 %v1412_v6 }
 0x78b   :  { %v671_v34 = vpop.f32.mrf.mxu0 }
 0x78c   :  { %v675_v35 = vadd.f32 %v671_v34, %v598_v33 }
 0x78d   :  { %v1292_v36 = vpop.f32.mrf.mxu0 }
 0x78e   :  { %1372 = vtanh.f32 %v675_v35  ;;  %v1160_v39 = vmul.f32 -1.442695, %v675_v35 }
 0x790   :  { %1374 = vpow2.f32 %v1160_v39  ;;  %v1022_v39 = vld [vmem:[#allocation2 + $0x38] sm:$0xff] }
 0x79b   :  { %v1373_v38 = vpop.eup %1372 }
 0x79c   :  { %685 = vrot.lane.b32.xlu1 %v1373_v38, %s1414_s5 }
 0x79d   :  { %v1375_v40 = vpop.eup %1374 }
 0x79e   :  { %v679_v41 = vadd.f32 1.0, %v1375_v40 }
 0x7a0   :  { %1376 = vrcp.f32 %v679_v41 }
 0x7ad   :  { %v1377_v42 = vpop.eup %1376 }
 0x7ae   :  { %v683_v44 = vmul.f32 %v1377_v42, %v583_v28 }
 0x80e   :  { %v686_v43 = vpop.permute.xlu1 %685 }
 0x80f   :  { %v688_v45 = vmul.f32 %v1558_v37, %v686_v43 }
 0x811   :  { %v689_v46 = vadd.f32 %v688_v45, %v683_v44 }
 0x813   :  { %1378 = vtanh.f32 %v689_v46  ;;  %1162 = vst.msk [vmem:[%s1743_s8 + $0x18] sm:$0xff] %vm285_vm6, %v689_v46 }
 0x820   :  { %v1379_v47 = vpop.eup %1378 }
 0x821   :  { %692 = vrot.lane.b32.xlu0 %v1379_v47, %s1415_s14 }
 0x893   :  { %v693_v48 = vpop.permute.xlu0 %692 }
 0x894   :  { %v695_v49 = vmul.f32 %v1377_v42, %v693_v48 }
 0x896   :  { %697 = vrot.lane.b32.xlu1 %v695_v49, %s1416_s2 }
 0x908   :  { %v698_v50 = vpop.permute.xlu1 %697 }
 0x909   :  { %1161 = vst.msk [vmem:[%s1744_s7 + $0x18] sm:$0xff] %vm285_vm6, %v698_v50  ;;  %1302 = vmatmul.mubr.msk.f32.vlgmr.msra.gmra.mxu1 %vm285_vm6, %v698_v50 }
 0x90a   :  { %1316 = vmatpush3.msra.mxu1 %v1493_v8  ;;  %1323 = vmatprep.mubr.msk.f32.mxu1 %vm1413_vm3, %v1412_v6 }
 0x90b   :  { %1317 = vmatprep.subr.mxu1 %v1412_v6 }
 0x90c   :  { %1318 = vmatpush3.msra.mxu1 %v1501_v9 }
 0x90d   :  { %1319 = vmatprep.subr.mxu1 %v1412_v6 }
 0x90e   :  { %1320 = vmatpush3.msra.mxu1 %v1511_v10 }
 0x90f   :  { %1321 = vmatprep.subr.mxu1 %v1412_v6 }
 0x910   :  { %1322 = vmatpush3.msra.mxu1 %v1520_v11 }
 0x9c9   :  { %v777_v52 = vpop.f32.mrf.mxu1 }
 0x9ca   :  { %v781_v53 = vadd.f32 %v777_v52, %v704_v51 }
 0x9cb   :  { %v1303_v54 = vpop.f32.mrf.mxu1 }
 0x9cc   :  { %1380 = vtanh.f32 %v781_v53  ;;  %v1164_v56 = vmul.f32 -1.442695, %v781_v53 }
 0x9ce   :  { %1382 = vpow2.f32 %v1164_v56 }
 0x9d9   :  { %v1381_v55 = vpop.eup %1380 }
 0x9da   :  { %791 = vrot.lane.b32.xlu0 %v1381_v55, %s1414_s5 }
 0x9db   :  { %v1383_v57 = vpop.eup %1382 }
 0x9dc   :  { %v785_v58 = vadd.f32 1.0, %v1383_v57 }
 0x9de   :  { %1384 = vrcp.f32 %v785_v58 }
 0x9eb   :  { %v1385_v59 = vpop.eup %1384 }
 0x9ec   :  { %v789_v61 = vmul.f32 %v1385_v59, %v689_v46 }
 0xa4c   :  { %v792_v60 = vpop.permute.xlu0 %791 }
 0xa4d   :  { %v794_v62 = vmul.f32 %v1558_v37, %v792_v60 }
 0xa4f   :  { %v795_v63 = vadd.f32 %v794_v62, %v789_v61 }
 0xa51   :  { %1386 = vtanh.f32 %v795_v63  ;;  %1166 = vst.msk [vmem:[%s1743_s8 + $0x20] sm:$0xff] %vm285_vm6, %v795_v63 }
 0xa5e   :  { %v1387_v0 = vpop.eup %1386 }
 0xa5f   :  { %798 = vrot.lane.b32.xlu1 %v1387_v0, %s1415_s14 }
 0xad1   :  { %v799_v1 = vpop.permute.xlu1 %798 }
 0xad2   :  { %v801_v2 = vmul.f32 %v1385_v59, %v799_v1 }
 0xad4   :  { %803 = vrot.lane.b32.xlu0 %v801_v2, %s1416_s2 }
 0xb46   :  { %v804_v3 = vpop.permute.xlu0 %803 }
 0xb47   :  { %1165 = vst.msk [vmem:[%s1744_s7 + $0x20] sm:$0xff] %vm285_vm6, %v804_v3  ;;  %1313 = vmatmul.mubr.msk.f32.vlgmr.msra.gmra.mxu0 %vm285_vm6, %v804_v3 }
 0xb48   :  { %1327 = vmatpush3.msra.mxu0 %v1493_v8  ;;  %1334 = vmatprep.mubr.msk.f32.mxu0 %vm1413_vm3, %v1412_v6 }
 0xb49   :  { %1328 = vmatprep.subr.mxu0 %v1412_v6 }
 0xb4a   :  { %1329 = vmatpush3.msra.mxu0 %v1501_v9 }
 0xb4b   :  { %1330 = vmatprep.subr.mxu0 %v1412_v6 }
 0xb4c   :  { %1331 = vmatpush3.msra.mxu0 %v1511_v10 }
 0xb4d   :  { %1332 = vmatprep.subr.mxu0 %v1412_v6 }
 0xb4e   :  { %1333 = vmatpush3.msra.mxu0 %v1520_v11 }
 0xc07   :  { %v883_v5 = vpop.f32.mrf.mxu0 }
 0xc08   :  { %v887_v7 = vadd.f32 %v883_v5, %v810_v4 }
 0xc09   :  { %v1314_v12 = vpop.f32.mrf.mxu0 }
 0xc0a   :  { %1388 = vtanh.f32 %v887_v7  ;;  %v1168_v13 = vmul.f32 -1.442695, %v887_v7 }
 0xc0c   :  { %1390 = vpow2.f32 %v1168_v13 }
 0xc17   :  { %v1389_v8 = vpop.eup %1388 }
 0xc18   :  { %897 = vrot.lane.b32.xlu1 %v1389_v8, %s1414_s5 }
 0xc19   :  { %v1391_v14 = vpop.eup %1390 }
 0xc1a   :  { %v891_v9 = vadd.f32 1.0, %v1391_v14 }
 0xc1c   :  { %1392 = vrcp.f32 %v891_v9 }
 0xc29   :  { %v1393_v15 = vpop.eup %1392 }
 0xc2a   :  { %v895_v10 = vmul.f32 %v1393_v15, %v795_v63 }
 0xc8a   :  { %v898_v16 = vpop.permute.xlu1 %897 }
 0xc8b   :  { %v900_v6 = vmul.f32 %v1558_v37, %v898_v16 }
 0xc8d   :  { %v901_v17 = vadd.f32 %v900_v6, %v895_v10 }
 0xc8f   :  { %1394 = vtanh.f32 %v901_v17  ;;  %1170 = vst.msk [vmem:[%s1743_s8 + $0x28] sm:$0xff] %vm285_vm6, %v901_v17 }
 0xc9c   :  { %v1395_v11 = vpop.eup %1394 }
 0xc9d   :  { %904 = vrot.lane.b32.xlu0 %v1395_v11, %s1415_s14 }
 0xd0f   :  { %v905_v18 = vpop.permute.xlu0 %904 }
 0xd10   :  { %v907_v19 = vmul.f32 %v1393_v15, %v905_v18 }
 0xd12   :  { %909 = vrot.lane.b32.xlu1 %v907_v19, %s1416_s2 }
 0xd84   :  { %v910_v20 = vpop.permute.xlu1 %909 }
 0xd85   :  { %1169 = vst.msk [vmem:[%s1744_s7 + $0x28] sm:$0xff] %vm285_vm6, %v910_v20  ;;  %1324 = vmatmul.mubr.msk.f32.vlgmr.msra.gmra.mxu1 %vm285_vm6, %v910_v20 }
 0xe45   :  { %v989_v22 = vpop.f32.mrf.mxu1 }
 0xe46   :  { %v993_v23 = vadd.f32 %v989_v22, %v916_v21 }
 0xe47   :  { %v1325_v24 = vpop.f32.mrf.mxu1 }
 0xe48   :  { %1396 = vtanh.f32 %v993_v23  ;;  %v1172_v26 = vmul.f32 -1.442695, %v993_v23 }
 0xe4a   :  { %1398 = vpow2.f32 %v1172_v26 }
 0xe55   :  { %v1397_v25 = vpop.eup %1396 }
 0xe56   :  { %1003 = vrot.lane.b32.xlu0 %v1397_v25, %s1414_s5 }
 0xe57   :  { %v1399_v27 = vpop.eup %1398 }
 0xe58   :  { %v997_v28 = vadd.f32 1.0, %v1399_v27 }
 0xe5a   :  { %1400 = vrcp.f32 %v997_v28 }
 0xe67   :  { %v1401_v29 = vpop.eup %1400 }
 0xe68   :  { %v1001_v31 = vmul.f32 %v1401_v29, %v901_v17 }
 0xec8   :  { %v1004_v30 = vpop.permute.xlu0 %1003 }
 0xec9   :  { %v1006_v32 = vmul.f32 %v1558_v37, %v1004_v30 }
 0xecb   :  { %v1007_v33 = vadd.f32 %v1006_v32, %v1001_v31 }
 0xecd   :  { %1402 = vtanh.f32 %v1007_v33  ;;  %1174 = vst.msk [vmem:[%s1743_s8 + $0x30] sm:$0xff] %vm285_vm6, %v1007_v33 }
 0xeda   :  { %v1403_v34 = vpop.eup %1402 }
 0xedb   :  { %1010 = vrot.lane.b32.xlu1 %v1403_v34, %s1415_s14 }
 0xf4d   :  { %v1011_v35 = vpop.permute.xlu1 %1010 }
 0xf4e   :  { %v1013_v36 = vmul.f32 %v1401_v29, %v1011_v35 }
 0xf50   :  { %1015 = vrot.lane.b32.xlu0 %v1013_v36, %s1416_s2 }
 0xfc2   :  { %v1016_v38 = vpop.permute.xlu0 %1015 }
 0xfc3   :  { %1173 = vst.msk [vmem:[%s1744_s7 + $0x30] sm:$0xff] %vm285_vm6, %v1016_v38  ;;  %1335 = vmatmul.mubr.msk.f32.vlgmr.msra.gmra.mxu0 %vm285_vm6, %v1016_v38 }
0x1083   :  { %v1095_v40 = vpop.f32.mrf.mxu0 }
0x1084   :  { %v1099_v41 = vadd.f32 %v1095_v40, %v1022_v39 }
0x1085   :  { %v1336_v42 = vpop.f32.mrf.mxu0 }
0x1086   :  { %1404 = vtanh.f32 %v1099_v41  ;;  %v1176_v44 = vmul.f32 -1.442695, %v1099_v41 }
0x1088   :  { %1406 = vpow2.f32 %v1176_v44 }
0x1093   :  { %v1405_v43 = vpop.eup %1404 }
0x1094   :  { %1109 = vrot.lane.b32.xlu1 %v1405_v43, %s1414_s5 }
0x1095   :  { %v1407_v45 = vpop.eup %1406 }
0x1096   :  { %v1103_v46 = vadd.f32 1.0, %v1407_v45 }
0x1098   :  { %1408 = vrcp.f32 %v1103_v46 }
0x10a5   :  { %v1409_v47 = vpop.eup %1408 }
0x10a6   :  { %v1107_v49 = vmul.f32 %v1409_v47, %v1007_v33 }
0x1106   :  { %v1110_v48 = vpop.permute.xlu1 %1109 }
0x1107   :  { %v1112_v50 = vmul.f32 %v1558_v37, %v1110_v48 }
0x1109   :  { %v1113_v51 = vadd.f32 %v1112_v50, %v1107_v49 }
0x110b   :  { %1410 = vtanh.f32 %v1113_v51  ;;  %1178 = vst.msk [vmem:[%s1743_s8 + $0x38] sm:$0xff] %vm285_vm6, %v1113_v51 }
0x1118   :  { %v1411_v52 = vpop.eup %1410 }
0x1119   :  { %1116 = vrot.lane.b32.xlu0 %v1411_v52, %s1415_s14 }
0x118b   :  { %v1117_v53 = vpop.permute.xlu0 %1116 }
0x118c   :  { %v1119_v54 = vmul.f32 %v1409_v47, %v1117_v53 }
0x118e   :  { %1121 = vrot.lane.b32.xlu1 %v1119_v54, %s1416_s2 }
0x1200   :  { %v1122_v55 = vpop.permute.xlu1 %1121 }
0x1201   :  { %1177 = vst.msk [vmem:[%s1744_s7 + $0x38] sm:$0xff] %vm285_vm6, %v1122_v55 }

</bundles_post_ra>
